<compile_context>
chip_gen: v7x
topology: tpu7x:2x2x1
jax: 0.10.0
libtpu: 0.0.40
codegen_flags: <defaults>
</compile_context>

<pallas_src>
import functools

import jax
import jax.numpy as jnp
from jax.experimental import pallas as pl
from jax.experimental.pallas import tpu as pltpu


def _dsconv_kernel(x_ref, mdw_ref, dwb_ref, mpw_ref, pwb_ref, o_ref, *, ksize, stride):
    """One grid step: `bt` images packed along the lane axis.

    x_ref   : (Hp, bt*W*Cin)           H-padded input slab, lane index = (b, w, cin)
    mdw_ref : (k, bt*W*Cin, bt*Wo*Cin)  per-ky banded depthwise matrices (BN scale,
                                        W-halo and per-image block-diagonality folded in)
    dwb_ref : (1, bt*Wo*Cin)            depthwise BN shift, tiled over (b, w)
    mpw_ref : (bt*Wo*Cin, bt*Wo*Cout)   block-diagonal pointwise matrix (BN scale folded in)
    pwb_ref : (1, bt*Wo*Cout)           pointwise BN shift, tiled over (b, w)
    o_ref   : (Ho, bt*Wo*Cout)          lane-dense output slab
    """
    Ho = o_ref.shape[0]

    # ---- depthwise conv (+ folded BN scale): k banded matmuls, one per ky tap ----
    acc = jnp.zeros((Ho, mdw_ref.shape[2]), jnp.float32)
    for ky in range(ksize):
        if stride == 1:
            rows = x_ref[ky:ky + Ho, :]                       # static sublane-offset load
        else:
            # TODO(synk): strided sublane read kept for generality; only stride=1 is tested.
            rows = x_ref[pl.ds(ky, Ho, stride), :]
        acc = acc + jnp.dot(rows.astype(jnp.float32), mdw_ref[ky],
                            preferred_element_type=jnp.float32)

    # ---- BN shift + ReLU (scale already folded into mdw) ----
    dw = jnp.maximum(acc + dwb_ref[...], 0.0)                 # (Ho, bt*Wo*Cin)

    # ---- pointwise 1x1 conv (+ folded BN scale) as one block-diag matmul ----
    pw = jnp.dot(dw, mpw_ref[...], preferred_element_type=jnp.float32)
    o_ref[...] = jnp.maximum(pw + pwb_ref[...], 0.0).astype(o_ref.dtype)   # lane-dense store


def depthwise_separable_conv_block(x_nchw, params, *, ksize, stride):
    """Matches the PyTorch module (eval mode): x is NCHW, returns NCHW."""
    B, Cin, H, W = x_nchw.shape
    Cout = params["w_pw"].shape[1]
    pad = ksize // 2
    eps = 1e-5
    Ho = (H + 2 * pad - ksize) // stride + 1
    Wo = (W + 2 * pad - ksize) // stride + 1
    Hp = H + 2 * pad

    # Fold BatchNorm (inference) into per-channel scale/shift, then fold the scales into
    # the conv weights so the kernel only does shift + ReLU.
    dw_scale = params["dw_gamma"] / jnp.sqrt(params["dw_var"] + eps)
    dw_shift = params["dw_beta"] - params["dw_mean"] * dw_scale
    pw_scale = params["pw_gamma"] / jnp.sqrt(params["pw_var"] + eps)
    pw_shift = params["pw_beta"] - params["pw_mean"] * pw_scale

    wdw = params["w_dw"].reshape(ksize, ksize, Cin).astype(jnp.float32) \
        * dw_scale[None, None, :]                                        # (k, k, Cin)
    wpw = params["w_pw"].astype(jnp.float32) * pw_scale[None, :]         # (Cin, Cout)

    # ---- pick the batch tile: largest divisor of B with a bounded VMEM step footprint
    #      and a legal lane block (block == full array, or lane width % 128 == 0) ----
    def step_bytes(bt):
        return 4 * (2 * (Hp * bt * W * Cin + Ho * bt * Wo * Cout)
                    + ksize * (bt * W * Cin) * (bt * Wo * Cin)
                    + (bt * Wo * Cin) * (bt * Wo * Cout)
                    + 2 * bt * Wo * (Cin + Cout))

    bt = B
    for cand in sorted((d for d in range(1, B + 1) if B % d == 0), reverse=True):
        if step_bytes(cand) <= 8 * 1024 * 1024 and (cand == B or (cand * W * Cin) % 128 == 0):
            bt = cand
            break

    # Banded depthwise matrices (per image):
    #   m[ (w_in)*Cin + c, (w_out)*Cin + c ] = sum_kx [w_in == w_out*stride + kx - pad] * wdw[ky,kx,c]
    # Entries that would read the W zero-padding are simply absent -> W-halo folded in.
    # kron(eye(bt), m) makes it block-diagonal over the bt images packed along lanes.
    w_out = jnp.arange(Wo)
    eye_bt = jnp.eye(bt, dtype=jnp.float32)
    m_dw_taps = []
    for ky in range(ksize):
        m = jnp.zeros((W * Cin, Wo * Cin), jnp.float32)
        for kx in range(ksize):
            w_in = w_out * stride + kx - pad
            valid = ((w_in >= 0) & (w_in < W)).astype(jnp.float32)
            sel = jnp.zeros((W, Wo), jnp.float32).at[
                jnp.clip(w_in, 0, W - 1), w_out].add(valid)              # (W, Wo) 0/1 band
            m = m + jnp.kron(sel, jnp.diag(wdw[ky, kx]))
        m_dw_taps.append(jnp.kron(eye_bt, m))
    m_dw = jnp.stack(m_dw_taps)                                # (k, bt*W*Cin, bt*Wo*Cin)

    # Block-diagonal pointwise matrix: one (Cin, Cout) block per (image, output column).
    m_pw = jnp.kron(jnp.eye(bt * Wo, dtype=jnp.float32), wpw)  # (bt*Wo*Cin, bt*Wo*Cout)

    dwb = jnp.tile(dw_shift.astype(jnp.float32), bt * Wo).reshape(1, bt * Wo * Cin)
    pwb = jnp.tile(pw_shift.astype(jnp.float32), bt * Wo).reshape(1, bt * Wo * Cout)

    # NCHW -> (H, B, W, Cin) -> (H, B*W*Cin), then zero-pad H.  This is the only layout
    # glue (unavoidable for the NCHW contract); the W halo lives in the band matrices.
    # TODO(synk): if the surrounding model were NHWC end-to-end this transpose would go away.
    x = jnp.transpose(x_nchw, (2, 0, 3, 1)).reshape(H, B * W * Cin)
    x = jnp.pad(x, ((pad, pad), (0, 0)))                       # (Hp, B*W*Cin)

    kernel = functools.partial(_dsconv_kernel, ksize=ksize, stride=stride)
    out_flat = pl.pallas_call(
        kernel,
        out_shape=jax.ShapeDtypeStruct((Ho, B * Wo * Cout), x_nchw.dtype),
        grid=(B // bt,),
        in_specs=[
            pl.BlockSpec((Hp, bt * W * Cin), lambda i: (0, i)),
            pl.BlockSpec((ksize, bt * W * Cin, bt * Wo * Cin), lambda i: (0, 0, 0)),
            pl.BlockSpec((1, bt * Wo * Cin), lambda i: (0, 0)),
            pl.BlockSpec((bt * Wo * Cin, bt * Wo * Cout), lambda i: (0, 0)),
            pl.BlockSpec((1, bt * Wo * Cout), lambda i: (0, 0)),
        ],
        out_specs=pl.BlockSpec((Ho, bt * Wo * Cout), lambda i: (0, i)),
        compiler_params=pltpu.CompilerParams(
            dimension_semantics=("parallel",),
        ),
    )(x, m_dw, dwb, m_pw, pwb)

    out = out_flat.reshape(Ho, B, Wo, Cout)
    return jnp.transpose(out, (1, 3, 0, 2))                    # back to NCHW


def _reference(x_nchw, params, *, ksize, stride):
    """Pure-JAX reference (matches PyTorch eval-mode semantics), full f32 precision."""
    eps = 1e-5
    B, Cin, H, W = x_nchw.shape
    Cout = params["w_pw"].shape[1]
    pad = ksize // 2
    x = jnp.transpose(x_nchw, (0, 2, 3, 1)).astype(jnp.float32)

    w_dw = params["w_dw"].reshape(ksize, ksize, 1, Cin)  # HWIO, grouped
    y = jax.lax.conv_general_dilated(
        x, w_dw, (stride, stride), [(pad, pad), (pad, pad)],
        dimension_numbers=("NHWC", "HWIO", "NHWC"), feature_group_count=Cin,
        precision=jax.lax.Precision.HIGHEST)
    y = (y - params["dw_mean"]) / jnp.sqrt(params["dw_var"] + eps) \
        * params["dw_gamma"] + params["dw_beta"]
    y = jnp.maximum(y, 0.0)

    w_pw = params["w_pw"].reshape(1, 1, Cin, Cout)
    z = jax.lax.conv_general_dilated(
        y, w_pw, (1, 1), [(0, 0), (0, 0)],
        dimension_numbers=("NHWC", "HWIO", "NHWC"),
        precision=jax.lax.Precision.HIGHEST)
    z = (z - params["pw_mean"]) / jnp.sqrt(params["pw_var"] + eps) \
        * params["pw_gamma"] + params["pw_beta"]
    z = jnp.maximum(z, 0.0)
    return jnp.transpose(z, (0, 3, 1, 2))


if __name__ == "__main__":
    # Small shapes consistent with the module: batch=2, in_ch=4, out_ch=8,
    # spatial=16x16, kernel_size=3, stride=1.
    B, CIN, COUT, H, W = 2, 4, 8, 16, 16
    KSIZE, STRIDE = 3, 1

    key = jax.random.PRNGKey(0)
    keys = jax.random.split(key, 10)

    x = jax.random.normal(keys[0], (B, CIN, H, W), dtype=jnp.float32)

    params = {
        # depthwise weight: PyTorch shape (Cin, 1, k, k) stored here as (k*k, Cin),
        # i.e. w_dw[ky*k + kx, c] == torch_weight[c, 0, ky, kx]
        "w_dw": jax.random.normal(keys[1], (KSIZE * KSIZE, CIN), jnp.float32) * 0.3,
        # pointwise weight: PyTorch shape (Cout, Cin, 1, 1) stored here as (Cin, Cout)
        "w_pw": jax.random.normal(keys[2], (CIN, COUT), jnp.float32) * 0.3,
        # BatchNorm2d(in_channels) params / running stats (inference form)
        "dw_gamma": 0.5 + jax.random.uniform(keys[3], (CIN,), jnp.float32),
        "dw_beta": 0.1 * jax.random.normal(keys[4], (CIN,), jnp.float32),
        "dw_mean": 0.1 * jax.random.normal(keys[5], (CIN,), jnp.float32),
        "dw_var": 0.5 + jax.random.uniform(keys[6], (CIN,), jnp.float32),
        # BatchNorm2d(out_channels)
        "pw_gamma": 0.5 + jax.random.uniform(keys[7], (COUT,), jnp.float32),
        "pw_beta": 0.1 * jax.random.normal(keys[8], (COUT,), jnp.float32),
        "pw_mean": jnp.zeros((COUT,), jnp.float32),
        "pw_var": 0.5 + jax.random.uniform(keys[9], (COUT,), jnp.float32),
    }

    out = depthwise_separable_conv_block(x, params, ksize=KSIZE, stride=STRIDE)
    out = jax.block_until_ready(out)

    ref = _reference(x, params, ksize=KSIZE, stride=STRIDE)
    assert out.shape == (B, COUT, H, W), out.shape
    assert jnp.allclose(out, ref, rtol=1e-4, atol=1e-4), \
        float(jnp.max(jnp.abs(out - ref)))

    print("KERNEL_OK")
</pallas_src>

<mosaic_0001>
module attributes {stable_mosaic.version = 11 : i64} {
  func.func @_dsconv_kernel(%arg0: i32, %arg1: memref<18x128xf32, #tpu.memory_space<vmem>>, %arg2: memref<3x128x128xf32, #tpu.memory_space<vmem>>, %arg3: memref<1x128xf32, #tpu.memory_space<vmem>>, %arg4: memref<128x256xf32, #tpu.memory_space<vmem>>, %arg5: memref<1x256xf32, #tpu.memory_space<vmem>>, %arg6: memref<16x256xf32, #tpu.memory_space<vmem>>) attributes {dimension_semantics = [#tpu.dimension_semantics<parallel>], iteration_bounds = array<i64: 1>, scalar_prefetch = 0 : i64, scratch_operands = 0 : i64, tpu.core_type = #tpu.core_type<tc>, window_params = [{transform_indices = @transform_0, window_bounds = array<i64: 18, 128>}, {pipeline_mode = #tpu.pipeline_mode<synchronous>, transform_indices = @transform_1, window_bounds = array<i64: 3, 128, 128>}, {pipeline_mode = #tpu.pipeline_mode<synchronous>, transform_indices = @transform_2, window_bounds = array<i64: 1, 128>}, {pipeline_mode = #tpu.pipeline_mode<synchronous>, transform_indices = @transform_3, window_bounds = array<i64: 128, 256>}, {pipeline_mode = #tpu.pipeline_mode<synchronous>, transform_indices = @transform_4, window_bounds = array<i64: 1, 256>}, {transform_indices = @transform_5, window_bounds = array<i64: 16, 256>}]} {
    %cst = arith.constant 0.000000e+00 : f32
    %0 = vector.broadcast %cst : f32 to vector<16x128xf32>
    %c0 = arith.constant 0 : index
    %c0_0 = arith.constant 0 : index
    %1 = vector.load %arg1[%c0, %c0_0] : memref<18x128xf32, #tpu.memory_space<vmem>>, vector<16x128xf32>
    %c0_1 = arith.constant 0 : index
    %c0_2 = arith.constant 0 : index
    %c0_3 = arith.constant 0 : index
    %2 = vector.load %arg2[%c0_1, %c0_2, %c0_3] : memref<3x128x128xf32, #tpu.memory_space<vmem>>, vector<1x128x128xf32>
    %3 = vector.shape_cast %2 : vector<1x128x128xf32> to vector<128x128xf32>
    %cst_4 = arith.constant dense<0.000000e+00> : vector<16x128xf32>
    %4 = tpu.matmul %1, %3, %cst_4 {dimension_numbers = #tpu.dot_dimension_numbers<[1], [0], [0], [1], [0, 0, 1, 1], [], []>} : vector<16x128xf32>, vector<128x128xf32>, vector<16x128xf32> -> vector<16x128xf32>
    %5 = arith.addf %0, %4 : vector<16x128xf32>
    %c1 = arith.constant 1 : index
    %c0_5 = arith.constant 0 : index
    %6 = vector.load %arg1[%c1, %c0_5] : memref<18x128xf32, #tpu.memory_space<vmem>>, vector<16x128xf32>
    %c1_6 = arith.constant 1 : index
    %c0_7 = arith.constant 0 : index
    %c0_8 = arith.constant 0 : index
    %7 = vector.load %arg2[%c1_6, %c0_7, %c0_8] : memref<3x128x128xf32, #tpu.memory_space<vmem>>, vector<1x128x128xf32>
    %8 = vector.shape_cast %7 : vector<1x128x128xf32> to vector<128x128xf32>
    %cst_9 = arith.constant dense<0.000000e+00> : vector<16x128xf32>
    %9 = tpu.matmul %6, %8, %cst_9 {dimension_numbers = #tpu.dot_dimension_numbers<[1], [0], [0], [1], [0, 0, 1, 1], [], []>} : vector<16x128xf32>, vector<128x128xf32>, vector<16x128xf32> -> vector<16x128xf32>
    %10 = arith.addf %5, %9 : vector<16x128xf32>
    %c2 = arith.constant 2 : index
    %c0_10 = arith.constant 0 : index
    %11 = vector.load %arg1[%c2, %c0_10] : memref<18x128xf32, #tpu.memory_space<vmem>>, vector<16x128xf32>
    %c2_11 = arith.constant 2 : index
    %c0_12 = arith.constant 0 : index
    %c0_13 = arith.constant 0 : index
    %12 = vector.load %arg2[%c2_11, %c0_12, %c0_13] : memref<3x128x128xf32, #tpu.memory_space<vmem>>, vector<1x128x128xf32>
    %13 = vector.shape_cast %12 : vector<1x128x128xf32> to vector<128x128xf32>
    %cst_14 = arith.constant dense<0.000000e+00> : vector<16x128xf32>
    %14 = tpu.matmul %11, %13, %cst_14 {dimension_numbers = #tpu.dot_dimension_numbers<[1], [0], [0], [1], [0, 0, 1, 1], [], []>} : vector<16x128xf32>, vector<128x128xf32>, vector<16x128xf32> -> vector<16x128xf32>
    %15 = arith.addf %10, %14 : vector<16x128xf32>
    %c0_15 = arith.constant 0 : index
    %c0_16 = arith.constant 0 : index
    %16 = vector.load %arg3[%c0_15, %c0_16] : memref<1x128xf32, #tpu.memory_space<vmem>>, vector<1x128xf32>
    %17 = vector.broadcast %16 : vector<1x128xf32> to vector<16x128xf32>
    %18 = arith.addf %15, %17 : vector<16x128xf32>
    %cst_17 = arith.constant 0.000000e+00 : f32
    %19 = vector.broadcast %cst_17 : f32 to vector<16x128xf32>
    %20 = arith.maximumf %18, %19 : vector<16x128xf32>
    %c0_18 = arith.constant 0 : index
    %c0_19 = arith.constant 0 : index
    %21 = vector.load %arg4[%c0_18, %c0_19] : memref<128x256xf32, #tpu.memory_space<vmem>>, vector<128x256xf32>
    %cst_20 = arith.constant dense<0.000000e+00> : vector<16x256xf32>
    %22 = tpu.matmul %20, %21, %cst_20 {dimension_numbers = #tpu.dot_dimension_numbers<[1], [0], [0], [1], [0, 0, 1, 1], [], []>} : vector<16x128xf32>, vector<128x256xf32>, vector<16x256xf32> -> vector<16x256xf32>
    %c0_21 = arith.constant 0 : index
    %c0_22 = arith.constant 0 : index
    %23 = vector.load %arg5[%c0_21, %c0_22] : memref<1x256xf32, #tpu.memory_space<vmem>>, vector<1x256xf32>
    %24 = vector.broadcast %23 : vector<1x256xf32> to vector<16x256xf32>
    %25 = arith.addf %22, %24 : vector<16x256xf32>
    %cst_23 = arith.constant 0.000000e+00 : f32
    %26 = vector.broadcast %cst_23 : f32 to vector<16x256xf32>
    %27 = arith.maximumf %25, %26 : vector<16x256xf32>
    %c0_24 = arith.constant 0 : index
    %c0_25 = arith.constant 0 : index
    %28 = vector.load %arg6[%c0_24, %c0_25] : memref<16x256xf32, #tpu.memory_space<vmem>>, vector<16x256xf32>
    tpu.vector_store %arg6[%c0_24, %c0_25], %27 {strides = array<i32>} : memref<16x256xf32, #tpu.memory_space<vmem>>, vector<16x256xf32>,
    return
  }
  func.func @transform_0(%arg0: i32) -> (i32, i32) {
    %c0_i32 = arith.constant 0 : i32
    %c0_i32_0 = arith.constant 0 : i32
    return %c0_i32, %arg0 : i32, i32
  }
  func.func @transform_1(%arg0: i32) -> (i32, i32, i32) {
    %c0_i32 = arith.constant 0 : i32
    %c0_i32_0 = arith.constant 0 : i32
    %c0_i32_1 = arith.constant 0 : i32
    %c0_i32_2 = arith.constant 0 : i32
    return %c0_i32, %c0_i32_0, %c0_i32_1 : i32, i32, i32
  }
  func.func @transform_2(%arg0: i32) -> (i32, i32) {
    %c0_i32 = arith.constant 0 : i32
    %c0_i32_0 = arith.constant 0 : i32
    %c0_i32_1 = arith.constant 0 : i32
    return %c0_i32, %c0_i32_0 : i32, i32
  }
  func.func @transform_3(%arg0: i32) -> (i32, i32) {
    %c0_i32 = arith.constant 0 : i32
    %c0_i32_0 = arith.constant 0 : i32
    %c0_i32_1 = arith.constant 0 : i32
    return %c0_i32, %c0_i32_0 : i32, i32
  }
  func.func @transform_4(%arg0: i32) -> (i32, i32) {
    %c0_i32 = arith.constant 0 : i32
    %c0_i32_0 = arith.constant 0 : i32
    %c0_i32_1 = arith.constant 0 : i32
    return %c0_i32, %c0_i32_0 : i32, i32
  }
  func.func @transform_5(%arg0: i32) -> (i32, i32) {
    %c0_i32 = arith.constant 0 : i32
    %c0_i32_0 = arith.constant 0 : i32
    return %c0_i32, %arg0 : i32, i32
  }
}

</mosaic_0001>

<bundles_post_ra>
// kernel: tpu_custom_call.1
= control target key start
LH: loop header
LB: loop body
LE: loop exit
PB: predicated region body
PF: predicated region fallthrough
CT: control target
= control target key end

     0   :  { %10 = vsyncpa [#allocation3], 0  ;;  %s1004_s0 = inlined_call_operand.hbm [shape: f32[18,128], index: 0, kind: input, shape index: {}]   ;;  %s1005_s1 = inlined_call_operand.hbm [shape: f32[3,128,128], index: 1, kind: input, shape index: {}]   ;;  %s1006_s2 = inlined_call_operand.vmem [shape: f32[1,128], index: 2, kind: input, shape index: {}]   ;;  %s1007_s3 = inlined_call_operand.hbm [shape: f32[128,256], index: 3, kind: input, shape index: {}]   ;;  %s1008_s4 = inlined_call_operand.vmem [shape: f32[1,256], index: 4, kind: input, shape index: {}]   ;;  %s1009_s5 = inlined_call_operand.hbm [shape: f32[16,256], index: 5, kind: output, shape index: {}]  }
   0x1   :  { %11 = vsyncpa [#allocation6], 0 }
   0x2   :  { %12 = vsyncpa [#allocation4], 0  ;;  %s898_s18 = smov [#allocation5]   ;;  %s899_s20 = smov [#allocation2]  }
   0x3   :  { %s30_s19 = sshll.u32 %s898_s18, 4  ;;  %s18_s21 = sshll.u32 %s899_s20, 4  ;;  %s31_s19 = int_to_ptr.vmem [resolvable:$true] %s30_s19  ;;  %s937_s21 = int_to_ptr.vmem [resolvable:$true] %s18_s21 }
   0x4   :  { %s804_s24 = scalar_lea.hbm %s1005_s1, 6144 }
   0x5   :  { %p805_p0 = scmp.ne.s32.totalorder %s1005_s1, %s804_s24  ;;  %p808_p1 = scmp.lt.u32.totalorder %s804_s24, %s1005_s1 }
   0x7   :  { %p810_p2 = pnand %p808_p1, %p805_p0 }
   0x9   :  { %813 = shalt.err (!%p810_p2)
}
   0xa   :  { %s814_s29 = scalar_lea.vmem %s31_s19, 6144  ;;  %p819_p4 = scmp.lt.s32.totalorder %s31_s19, %s31_s19 }
   0xb   :  { %p815_p3 = scmp.ne.s32.totalorder %s31_s19, %s814_s29  ;;  %p820_p5 = scmp.lt.s32.totalorder %s814_s29, %s814_s29 }
   0xd   :  { %p821_p6 = por %p820_p5, %p819_p4 }
   0xf   :  { %p822_p7 = pnand %p821_p6, %p815_p3 }
  0x11   :  { %825 = shalt.err (!%p822_p7)
}
  0x12   :  { %s900_s30 = smov 128   ;;  %s901_s6 = smov 8  }
  0x13   :  { %36 = dma.hbm_to_vmem [thread:$0]  %s1005_s1, 6144, %s31_s19, [#allocation6], %s900_s30, %s900_s30, %s901_s6  }
  0x14   :  { %s826_s11 = scalar_lea.hbm %s1004_s0, 384 }
  0x15   :  { %p827_p8 = scmp.ne.s32.totalorder %s1004_s0, %s826_s11  ;;  %p830_p9 = scmp.lt.u32.totalorder %s826_s11, %s1004_s0 }
  0x17   :  { %p832_p10 = pnand %p830_p9, %p827_p8 }
  0x19   :  { %835 = shalt.err (!%p832_p10)
}
  0x1a   :  { %s836_s16 = scalar_lea.vmem %s937_s21, 384  ;;  %p841_p12 = scmp.lt.s32.totalorder %s937_s21, %s937_s21 }
  0x1b   :  { %p837_p11 = scmp.ne.s32.totalorder %s937_s21, %s836_s16  ;;  %p842_p13 = scmp.lt.s32.totalorder %s836_s16, %s836_s16 }
  0x1d   :  { %p843_p0 = por %p842_p13, %p841_p12 }
  0x1f   :  { %p844_p1 = pnand %p843_p0, %p837_p11 }
  0x21   :  { %847 = shalt.err (!%p844_p1)
}
  0x22   :  { %24 = dma.hbm_to_vmem [thread:$0]  %s1004_s0, 384, %s937_s21, [#allocation3], %s900_s30, %s900_s30, %s901_s6  }
  0x23   :  { %s902_s18 = smov [#allocation7]   ;;  %s848_s23 = scalar_lea.hbm %s1007_s3, 4096 }
  0x24   :  { %s44_s19 = sshll.u32 %s902_s18, 4  ;;  %p849_p2 = scmp.ne.s32.totalorder %s1007_s3, %s848_s23  ;;  %s45_s19 = int_to_ptr.vmem [resolvable:$true] %s44_s19 }
  0x25   :  { %p852_p3 = scmp.lt.u32.totalorder %s848_s23, %s1007_s3 }
  0x27   :  { %p854_p4 = pnand %p852_p3, %p849_p2 }
  0x29   :  { %857 = shalt.err (!%p854_p4)
}
  0x2a   :  { %s858_s28 = scalar_lea.vmem %s45_s19, 4096  ;;  %p863_p6 = scmp.lt.s32.totalorder %s45_s19, %s45_s19 }
  0x2b   :  { %p859_p5 = scmp.ne.s32.totalorder %s45_s19, %s858_s28  ;;  %p864_p7 = scmp.lt.s32.totalorder %s858_s28, %s858_s28 }
  0x2d   :  { %p865_p8 = por %p864_p7, %p863_p6 }
  0x2f   :  { %p866_p9 = pnand %p865_p8, %p859_p5 }
  0x31   :  { %869 = shalt.err (!%p866_p9)
}
  0x32   :  { %s903_s0 = smov 256   ;;  %s904_s21 = smov 16  }
  0x33   :  { %50 = dma.hbm_to_vmem [thread:$0]  %s1007_s3, 4096, %s45_s19, [#allocation6], %s903_s0, %s903_s0, %s904_s21  }
  0x34   :  { %892 = dma.done.wait [#allocation3], 384  }
  0x35   :  { %893 = vsyncadd [#allocation3], 4294966912 }
  0x36   :  { %894 = dma.done.wait [#allocation6], 10240  }
  0x37   :  { %895 = vsyncadd [#allocation6], 4294957056  ;;  %v64_v0 = vld [vmem:[#allocation5] sm:$0xff]  ;;  %v65_v1 = vld [vmem:[#allocation5 + $0x8] sm:$0xff] }
  0x38   :  { %v66_v2 = vld [vmem:[#allocation5 + $0x10] sm:$0xff]  ;;  %v695_v3 = vpack.c.bf16 %v65_v1, %v64_v0  ;;  %v67_v4 = vld [vmem:[#allocation5 + $0x18] sm:$0xff]  ;;  %v68_v6 = vld [vmem:[#allocation5 + $0x20] sm:$0xff] }
  0x39   :  { %v699_v5 = vpack.c.bf16 %v67_v4, %v66_v2  ;;  %v69_v7 = vld [vmem:[#allocation5 + $0x28] sm:$0xff]  ;;  %v83_v9 = vld [vmem:[#allocation5 + $0x80] sm:$0xff]  ;;  %v70_v11 = vld [vmem:[#allocation5 + $0x30] sm:$0xff] }
  0x3a   :  { %696 = vmatprep.subr.bf16.mxu0 %v695_v3  ;;  %v703_v8 = vpack.c.bf16 %v69_v7, %v68_v6  ;;  %v84_v10 = vld [vmem:[#allocation5 + $0x88] sm:$0xff]  ;;  %v71_v12 = vld [vmem:[#allocation5 + $0x38] sm:$0xff]  ;;  %v85_v15 = vld [vmem:[#allocation5 + $0x90] sm:$0xff] }
  0x3b   :  { %698 = vmatpush3.bf16.msra.mxu0 %v695_v3  ;;  %v663_v13 = vpack.c.bf16 %v84_v10, %v83_v9  ;;  %v62_v14 = vld [vmem:[#allocation2] sm:$0xff]  ;;  %v86_v16 = vld [vmem:[#allocation5 + $0x98] sm:$0xff]  ;;  %v87_v18 = vld [vmem:[#allocation5 + $0xa0] sm:$0xff]  ;;  %v707_v19 = vpack.c.bf16 %v71_v12, %v70_v11 }
  0x3c   :  { %700 = vmatprep.subr.bf16.mxu0 %v699_v5  ;;  %625 = vmatprep.mubr.f32.mxu0 %v62_v14  ;;  %v667_v17 = vpack.c.bf16 %v86_v16, %v85_v15  ;;  %v88_v20 = vld [vmem:[#allocation5 + $0xa8] sm:$0xff]  ;;  %v72_v21 = vld [vmem:[#allocation5 + $0x40] sm:$0xff]  ;;  %v89_v24 = vld [vmem:[#allocation5 + $0xb0] sm:$0xff] }
  0x3d   :  { %664 = vmatprep.subr.bf16.mxu1 %v663_v13  ;;  %v73_v22 = vld [vmem:[#allocation5 + $0x48] sm:$0xff]  ;;  %v671_v23 = vpack.c.bf16 %v88_v20, %v87_v18  ;;  %v90_v25 = vld [vmem:[#allocation5 + $0xb8] sm:$0xff]  ;;  %v74_v27 = vld [vmem:[#allocation5 + $0x50] sm:$0xff] }
  0x3e   :  { %666 = vmatpush3.bf16.msra.mxu1 %v663_v13  ;;  %v711_v26 = vpack.c.bf16 %v73_v22, %v72_v21  ;;  %v75_v28 = vld [vmem:[#allocation5 + $0x58] sm:$0xff]  ;;  %v675_v29 = vpack.c.bf16 %v90_v25, %v89_v24  ;;  %v91_v30 = vld [vmem:[#allocation5 + $0xc0] sm:$0xff]  ;;  %v92_v31 = vld [vmem:[#allocation5 + $0xc8] sm:$0xff] }
  0x3f   :  { %702 = vmatpush3.bf16.msra.mxu0 %v699_v5  ;;  %668 = vmatprep.subr.bf16.mxu1 %v667_v17  ;;  %v80_v32 = vld [vmem:[#allocation2 + $0x1] sm:$0xff]  ;;  %v715_v33 = vpack.c.bf16 %v75_v28, %v74_v27  ;;  %v76_v34 = vld [vmem:[#allocation5 + $0x60] sm:$0xff]  ;;  %v679_v36 = vpack.c.bf16 %v92_v31, %v91_v30  ;;  %v94_v38 = vld [vmem:[#allocation5 + $0xd8] sm:$0xff] }
  0x40   :  { %704 = vmatprep.subr.bf16.mxu0 %v703_v8  ;;  %v77_v35 = vld [vmem:[#allocation5 + $0x68] sm:$0xff]  ;;  %590 = vmatprep.mubr.f32.mxu1 %v80_v32  ;;  %v93_v37 = vld [vmem:[#allocation5 + $0xd0] sm:$0xff]  ;;  %v79_v41 = vld [vmem:[#allocation5 + $0x78] sm:$0xff] }
  0x41   :  { %v719_v39 = vpack.c.bf16 %v77_v35, %v76_v34  ;;  %v78_v40 = vld [vmem:[#allocation5 + $0x70] sm:$0xff]  ;;  %v683_v42 = vpack.c.bf16 %v94_v38, %v93_v37  ;;  %v95_v43 = vld [vmem:[#allocation5 + $0xe0] sm:$0xff]  ;;  %v96_v44 = vld [vmem:[#allocation5 + $0xe8] sm:$0xff] }
  0x42   :  { %670 = vmatpush3.bf16.msra.mxu1 %v667_v17  ;;  %v723_v45 = vpack.c.bf16 %v79_v41, %v78_v40  ;;  %v252_v46 = vld [vmem:[#allocation5 + $0x100] sm:$0xff]  ;;  %v253_v47 = vld [vmem:[#allocation5 + $0x108] sm:$0xff]  ;;  %v687_v48 = vpack.c.bf16 %v96_v44, %v95_v43  ;;  %v97_v49 = vld [vmem:[#allocation5 + $0xf0] sm:$0xff] }
  0x43   :  { %706 = vmatpush3.bf16.msra.mxu0 %v703_v8  ;;  %672 = vmatprep.subr.bf16.mxu1 %v671_v23  ;;  %v98_v50 = vld [vmem:[#allocation5 + $0xf8] sm:$0xff]  ;;  %v727_v51 = vpack.c.bf16 %v253_v47, %v252_v46  ;;  %v254_v52 = vld [vmem:[#allocation5 + $0x110] sm:$0xff]  ;;  %v357_v55 = vld [vmem:[#allocation7 + $0x8] sm:$0xff] }
  0x44   :  { %708 = vmatprep.subr.bf16.mxu0 %v707_v19  ;;  %v255_v53 = vld [vmem:[#allocation5 + $0x118] sm:$0xff]  ;;  %v691_v54 = vpack.c.bf16 %v98_v50, %v97_v49  ;;  %v63_v57 = vld [vmem:[#allocation2 + $0x8] sm:$0xff]  ;;  %v256_v59 = vld [vmem:[#allocation5 + $0x120] sm:$0xff] }
  0x45   :  { %v359_v56 = vld [vmem:[#allocation7 + $0x18] sm:$0xff]  ;;  %v731_v58 = vpack.c.bf16 %v255_v53, %v254_v52  ;;  %v249_v60 = vld [vmem:[#allocation2 + $0x2] sm:$0xff]  ;;  %v356_v63 = vld [vmem:[#allocation7] sm:$0xff] }
  0x46   :  { %674 = vmatpush3.bf16.msra.mxu1 %v671_v23  ;;  %v257_v61 = vld [vmem:[#allocation5 + $0x128] sm:$0xff]  ;;  %v759_v62 = vpack.c.bf16 %v359_v56, %v357_v55  ;;  %v358_v0 = vld [vmem:[#allocation7 + $0x10] sm:$0xff]  ;;  %v363_v2 = vld [vmem:[#allocation7 + $0x38] sm:$0xff] }
  0x47   :  { %710 = vmatpush3.bf16.msra.mxu0 %v707_v19  ;;  %676 = vmatprep.subr.bf16.mxu1 %v675_v29  ;;  %v361_v1 = vld [vmem:[#allocation7 + $0x28] sm:$0xff]  ;;  %v735_v3 = vpack.c.bf16 %v257_v61, %v256_v59  ;;  %v258_v4 = vld [vmem:[#allocation5 + $0x130] sm:$0xff]  ;;  %v761_v6 = vpack.c.bf16 %v358_v0, %v356_v63  ;;  %v259_v7 = vld [vmem:[#allocation5 + $0x138] sm:$0xff] }
  0x48   :  { %712 = vmatprep.subr.bf16.mxu0 %v711_v26  ;;  %v81_v5 = vld [vmem:[#allocation2 + $0x9] sm:$0xff]  ;;  %v763_v8 = vpack.c.bf16 %v363_v2, %v361_v1  ;;  %v360_v9 = vld [vmem:[#allocation7 + $0x20] sm:$0xff]  ;;  %v365_v11 = vld [vmem:[#allocation7 + $0x48] sm:$0xff]  ;;  %v739_v13 = vpack.c.bf16 %v259_v7, %v258_v4 }
  0x49   :  { %v362_v10 = vld [vmem:[#allocation7 + $0x30] sm:$0xff]  ;;  %v367_v12 = vld [vmem:[#allocation7 + $0x58] sm:$0xff]  ;;  %v260_v14 = vld [vmem:[#allocation5 + $0x140] sm:$0xff] }
  0x4a   :  { %678 = vmatpush3.bf16.msra.mxu1 %v675_v29  ;;  %v765_v15 = vpack.c.bf16 %v362_v10, %v360_v9  ;;  %v261_v16 = vld [vmem:[#allocation5 + $0x148] sm:$0xff]  ;;  %v767_v17 = vpack.c.bf16 %v367_v12, %v365_v11  ;;  %v364_v18 = vld [vmem:[#allocation7 + $0x40] sm:$0xff]  ;;  %v366_v19 = vld [vmem:[#allocation7 + $0x50] sm:$0xff]  ;;  %v390_v10 = vlaneseq }
  0x4b   :  { %714 = vmatpush3.bf16.msra.mxu0 %v711_v26  ;;  %680 = vmatprep.subr.bf16.mxu1 %v679_v36  ;;  %v369_v20 = vld [vmem:[#allocation7 + $0x68] sm:$0xff]  ;;  %v371_v21 = vld [vmem:[#allocation7 + $0x78] sm:$0xff]  ;;  %v743_v22 = vpack.c.bf16 %v261_v16, %v260_v14  ;;  %v262_v23 = vld [vmem:[#allocation5 + $0x150] sm:$0xff]  ;;  %v769_v24 = vpack.c.bf16 %v366_v19, %v364_v18 }
  0x4c   :  { %716 = vmatprep.subr.bf16.mxu0 %v715_v33  ;;  %v263_v25 = vld [vmem:[#allocation5 + $0x158] sm:$0xff]  ;;  %v771_v26 = vpack.c.bf16 %v371_v21, %v369_v20  ;;  %v368_v27 = vld [vmem:[#allocation7 + $0x60] sm:$0xff]  ;;  %v370_v28 = vld [vmem:[#allocation7 + $0x70] sm:$0xff]  ;;  %v391_v11 = vshrl.u32 %v390_v10, 7 }
  0x4d   :  { %v373_v29 = vld [vmem:[#allocation7 + $0x88] sm:$0xff]  ;;  %v375_v30 = vld [vmem:[#allocation7 + $0x98] sm:$0xff]  ;;  %v747_v31 = vpack.c.bf16 %v263_v25, %v262_v23  ;;  %v264_v32 = vld [vmem:[#allocation5 + $0x160] sm:$0xff] }
  0x4e   :  { %682 = vmatpush3.bf16.msra.mxu1 %v679_v36  ;;  %v265_v34 = vld [vmem:[#allocation5 + $0x168] sm:$0xff]  ;;  %v775_v35 = vpack.c.bf16 %v375_v30, %v373_v29  ;;  %v372_v36 = vld [vmem:[#allocation7 + $0x80] sm:$0xff]  ;;  %v374_v37 = vld [vmem:[#allocation7 + $0x90] sm:$0xff]  ;;  %v392_v12 = vsub.s32 0, %v391_v11  ;;  %v396_v14 = vsub.s32 1, %v391_v11 }
  0x4f   :  { %718 = vmatpush3.bf16.msra.mxu0 %v715_v33  ;;  %684 = vmatprep.subr.bf16.mxu1 %v683_v42  ;;  %v773_v33 = vpack.c.bf16 %v370_v28, %v368_v27  ;;  %v377_v38 = vld [vmem:[#allocation7 + $0xa8] sm:$0xff]  ;;  %v751_v40 = vpack.c.bf16 %v265_v34, %v264_v32  ;;  %v266_v41 = vld [vmem:[#allocation5 + $0x170] sm:$0xff]  ;;  %v267_v43 = vld [vmem:[#allocation5 + $0x178] sm:$0xff] }
  0x50   :  { %720 = vmatprep.subr.bf16.mxu0 %v719_v39  ;;  %v378_v46 = vld [vmem:[#allocation7 + $0xb0] sm:$0xff]  ;;  %v755_v47 = vpack.c.bf16 %v267_v43, %v266_v41  ;;  %v381_v50 = vld [vmem:[#allocation7 + $0xc8] sm:$0xff]  ;;  %v380_v53 = vld [vmem:[#allocation7 + $0xc0] sm:$0xff] }
  0x51   :  { %v250_v49 = vld [vmem:[#allocation2 + $0xa] sm:$0xff]  ;;  %v385_v56 = vld [vmem:[#allocation7 + $0xe8] sm:$0xff]  ;;  %v384_v59 = vld [vmem:[#allocation7 + $0xe0] sm:$0xff] }
  0x52   :  { %686 = vmatpush3.bf16.msra.mxu1 %v683_v42  ;;  %v777_v42 = vpack.c.bf16 %v374_v37, %v372_v36 }
  0x53   :  { %722 = vmatpush3.bf16.msra.mxu0 %v719_v39  ;;  %688 = vmatprep.subr.bf16.mxu1 %v687_v48  ;;  %v379_v39 = vld [vmem:[#allocation7 + $0xb8] sm:$0xff] }
  0x54   :  { %724 = vmatprep.subr.bf16.mxu0 %v723_v45  ;;  %v779_v44 = vpack.c.bf16 %v379_v39, %v377_v38 }
  0x56   :  { %690 = vmatpush3.bf16.msra.mxu1 %v687_v48 }
  0x57   :  { %726 = vmatpush3.bf16.msra.mxu0 %v723_v45  ;;  %692 = vmatprep.subr.bf16.mxu1 %v691_v54  ;;  %v376_v45 = vld [vmem:[#allocation7 + $0xa0] sm:$0xff] }
  0x58   :  { %728 = vmatprep.subr.bf16.mxu0 %v727_v51  ;;  %v781_v48 = vpack.c.bf16 %v378_v46, %v376_v45 }
  0x5a   :  { %626 = vmatmul.mubr.f32.vlgmr.msra.gmra.mrb[0].mxu0 %v63_v57  ;;  %694 = vmatpush3.bf16.msra.mxu1 %v691_v54  ;;  %v382_v54 = vld [vmem:[#allocation7 + $0xd0] sm:$0xff]  ;;  %v387_v57 = vld [vmem:[#allocation7 + $0xf8] sm:$0xff] }
  0x5b   :  { %730 = vmatpush3.bf16.msra.mxu0 %v727_v51  ;;  %660 = vmatprep.mubr.f32.mxu0 %v249_v60  ;;  %v383_v51 = vld [vmem:[#allocation7 + $0xd8] sm:$0xff]  ;;  %v785_v55 = vpack.c.bf16 %v382_v54, %v380_v53  ;;  %v386_v60 = vld [vmem:[#allocation7 + $0xf0] sm:$0xff] }
  0x5c   :  { %732 = vmatprep.subr.bf16.mxu0 %v731_v58  ;;  %760 = vmatprep.subr.bf16.mxu1 %v759_v62  ;;  %v783_v52 = vpack.c.bf16 %v383_v51, %v381_v50  ;;  %v789_v61 = vpack.c.bf16 %v386_v60, %v384_v59  ;;  %v905_v62 = vmov 0.0  }
  0x5d   :  { %591 = vmatmul.mubr.f32.vlgmr.msra.gmra.mrb[0].mxu1 %v81_v5 }
  0x5e   :  { %762 = vmatpush1.bf16.msra.mxu1 %v761_v6  ;;  %464 = vmatprep.mubr.f32.mxu1 %v905_v62 }
  0x5f   :  { %734 = vmatpush3.bf16.msra.mxu0 %v731_v58  ;;  %764 = vmatprep.subr.bf16.mxu1 %v763_v8  ;;  %v787_v58 = vpack.c.bf16 %v387_v57, %v385_v56 }
  0x60   :  { %736 = vmatprep.subr.bf16.mxu0 %v735_v3 }
  0x62   :  { %766 = vmatpush1.bf16.msra.mxu1 %v765_v15 }
  0x63   :  { %738 = vmatpush3.bf16.msra.mxu0 %v735_v3  ;;  %768 = vmatprep.subr.bf16.mxu1 %v767_v17  ;;  %v503_v3 = vld [vmem:[%s1006_s2] ss:$0 sm:$0xff]  ;;  %s906_s2 = smov [#allocation8]  }
  0x64   :  { %740 = vmatprep.subr.bf16.mxu0 %v739_v13  ;;  %s490_s9 = sshll.u32 %s906_s2, 4  ;;  %s491_s9 = int_to_ptr.vmem [resolvable:$true] %s490_s9 }
  0x65   :  { %p875_p11 = scmp.lt.s32.totalorder %s491_s9, %s491_s9 }
  0x66   :  { %770 = vmatpush1.bf16.msra.mxu1 %v769_v24 }
  0x67   :  { %742 = vmatpush3.bf16.msra.mxu0 %v739_v13  ;;  %772 = vmatprep.subr.bf16.mxu1 %v771_v26  ;;  %v388_v13 = vld [vmem:[%s1008_s4] sm:$0x3]  ;;  %s870_s4 = scalar_lea.vmem %s491_s9, 512 }
  0x68   :  { %744 = vmatprep.subr.bf16.mxu0 %v743_v22  ;;  %v393_v15 = vrot.slane %v388_v13, %v392_v12  ;;  %v397_v16 = vrot.slane %v388_v13, %v396_v14  ;;  %p871_p10 = scmp.ne.s32.totalorder %s491_s9, %s870_s4  ;;  %p876_p12 = scmp.lt.s32.totalorder %s870_s4, %s870_s4 }
  0x6a   :  { %774 = vmatpush1.bf16.msra.mxu1 %v773_v33  ;;  %p877_p13 = por %p876_p12, %p875_p11 }
  0x6b   :  { %746 = vmatpush3.bf16.msra.mxu0 %v743_v22  ;;  %776 = vmatprep.subr.bf16.mxu1 %v775_v35 }
  0x6c   :  { %748 = vmatprep.subr.bf16.mxu0 %v747_v31  ;;  %p878_p0 = pnand %p877_p13, %p871_p10 }
  0x6e   :  { %778 = vmatpush1.bf16.msra.mxu1 %v777_v42 }
  0x6f   :  { %750 = vmatpush3.bf16.msra.mxu0 %v747_v31  ;;  %780 = vmatprep.subr.bf16.mxu1 %v779_v44 }
  0x70   :  { %752 = vmatprep.subr.bf16.mxu0 %v751_v40 }
  0x72   :  { %782 = vmatpush1.bf16.msra.mxu1 %v781_v48 }
  0x73   :  { %754 = vmatpush3.bf16.msra.mxu0 %v751_v40  ;;  %784 = vmatprep.subr.bf16.mxu1 %v783_v52 }
  0x74   :  { %756 = vmatprep.subr.bf16.mxu0 %v755_v47 }
  0x76   :  { %786 = vmatpush1.bf16.msra.mxu1 %v785_v55 }
  0x77   :  { %758 = vmatpush3.bf16.msra.mxu0 %v755_v47  ;;  %788 = vmatprep.subr.bf16.mxu1 %v787_v58 }
  0x7a   :  { %661 = vmatmul.mubr.f32.vlgmr.msra.gmra.mrb[0].mxu0 %v250_v49  ;;  %790 = vmatpush1.bf16.msra.mxu1 %v789_v61 }
 0x130   :  { %v592_v63 = vpop.f32.mrb[0].mxu1 }
 0x131   :  { %v165_v0 = vpop.f32.mrb[1].mxu1 }
 0x14d   :  { %v662_v1 = vpop.f32.mrb[0].mxu0 }
 0x14e   :  { %v791_v2 = vadd.f32 %v662_v1, %v592_v63  ;;  %v334_v4 = vpop.f32.mrb[1].mxu0 }
 0x14f   :  { %v792_v5 = vadd.f32 %v334_v4, %v165_v0 }
 0x150   :  { %v353_v7 = vadd.f32 %v791_v2, %v503_v3 }
 0x151   :  { %v352_v6 = vadd.f32 %v792_v5, %v503_v3 }
 0x152   :  { %v355_v9 = vmax.f32 %v353_v7, 0.0 }
 0x153   :  { %v354_v8 = vmax.f32 %v352_v6, 0.0 }
 0x155   :  { %465 = vmatmul.mubr.f32.vlgmr.msra.gmra.mrb[2].mxu1 %v354_v8 }
 0x156   :  { %470 = vmatprep.mubr.f32.mxu1 %v905_v62 }
 0x159   :  { %471 = vmatmul.mubr.f32.gmra.mrb[4].mxu1 %v355_v9 }
 0x228   :  { %v466_v17 = vpop.f32.mrb[2].mxu1 }
 0x229   :  { %v467_v18 = vadd.f32 %v466_v17, %v393_v15  ;;  %v468_v19 = vpop.f32.mrb[3].mxu1 }
 0x22a   :  { %v469_v20 = vadd.f32 %v468_v19, %v397_v16 }
 0x22b   :  { %v477_v21 = vmax.f32 %v467_v18, 0.0 }
 0x22c   :  { %v478_v22 = vmax.f32 %v469_v20, 0.0  ;;  %v472_v23 = vpop.f32.mrb[4].mxu1 }
 0x22d   :  { %481 = vst [vmem:[#allocation8] sm:$0xff] %v477_v21  ;;  %v473_v24 = vadd.f32 %v472_v23, %v393_v15  ;;  %v474_v25 = vpop.f32.mrb[5].mxu1 }
 0x22e   :  { %482 = vst [vmem:[#allocation8 + $0x8] sm:$0xff] %v478_v22  ;;  %v475_v26 = vadd.f32 %v474_v25, %v397_v16 }
 0x22f   :  { %v479_v27 = vmax.f32 %v473_v24, 0.0 }
 0x230   :  { %v480_v28 = vmax.f32 %v475_v26, 0.0 }
 0x231   :  { %483 = vst [vmem:[#allocation8 + $0x10] sm:$0xff] %v479_v27 }
 0x232   :  { %484 = vst [vmem:[#allocation8 + $0x18] sm:$0xff] %v480_v28 }
 0x233   :  { %881 = shalt.err (!%p878_p0)
}
 0x234   :  { %s882_s12 = scalar_lea.hbm %s1009_s5, 512 }
 0x235   :  { %p883_p1 = scmp.ne.s32.totalorder %s1009_s5, %s882_s12  ;;  %p886_p2 = scmp.lt.u32.totalorder %s882_s12, %s1009_s5 }
 0x237   :  { %p888_p3 = pnand %p886_p2, %p883_p1 }
 0x239   :  { %891 = shalt.err (!%p888_p3)
}
 0x23a   :  { %496 = dma.vmem_to_hbm [thread:$0]  %s491_s9, 512, %s1009_s5, [#allocation4], %s903_s0, %s903_s0, %s904_s21  }
 0x23b   :  { %896 = dma.done.wait [#allocation4], 512  }
 0x23c   :  { %897 = vsyncadd [#allocation4], 4294966784 }
 0x23d   :  { %500 = vsyncpa [#allocation3], 1 }
 0x23e   :  { %501 = vsyncpa [#allocation6], 1 }
 0x23f   :  { %502 = vsyncpa [#allocation4], 1 }

</bundles_post_ra>
